<compile_context>
chip_gen: v5e
topology: v5e:2x2
jax: 0.10.0
libtpu: 0.0.40
codegen_flags: <defaults>
</compile_context>

<pallas_src>
import jax
import jax.numpy as jnp
from jax.experimental import pallas as pl
from jax.experimental.pallas import tpu as pltpu


# ---------------------------------------------------------------------------
# Kernel 1: one-row gate MLP for both branches (runs once, no grid).
# ---------------------------------------------------------------------------
def _gate_kernel(ctx1_ref, w11_ref, b11_ref, w12_ref, b12_ref,
                 ctx2_ref, w21_ref, b21_ref, w22_ref, b22_ref,
                 gates_ref):
    """Compute gate{1,2} = 2*sigmoid(relu(ctx@W1+b1)@W2+b2) for a single ctx row each.

    gates_ref : (2, F) float32 — row 0 = gate1, row 1 = gate2.
    """
    def gate(ctx, w1, b1, w2, b2):
        h = jnp.dot(ctx, w1, preferred_element_type=jnp.float32) + b1
        h = jnp.maximum(h, 0.0)                                   # ReLU hidden
        logits = jnp.dot(h, w2, preferred_element_type=jnp.float32) + b2
        return 2.0 * jax.nn.sigmoid(logits)                       # Sigmoid output, *2

    g1 = gate(ctx1_ref[...], w11_ref[...], b11_ref[...], w12_ref[...], b12_ref[...])
    g2 = gate(ctx2_ref[...], w21_ref[...], b21_ref[...], w22_ref[...], b22_ref[...])
    gates_ref[...] = jnp.concatenate([g1, g2], axis=0)


def compute_gates(branch1_params, branch2_params):
    """Run the hoisted gate MLP once; returns a (2, F) float32 gate slab."""
    ctx1, w11, b11, w12, b12 = branch1_params
    ctx2, w21, b21, w22, b22 = branch2_params
    F = w12.shape[1]
    return pl.pallas_call(
        _gate_kernel,
        out_shape=jax.ShapeDtypeStruct((2, F), jnp.float32),
    )(ctx1, w11, b11, w12, b12, ctx2, w21, b21, w22, b22)


# ---------------------------------------------------------------------------
# Kernel 2: fused, batch-tiled elementwise scaling (mem-bound, both outputs).
# ---------------------------------------------------------------------------
def _scale_kernel(gates_ref, emb_ref, out1_ref, out2_ref):
    """out1 = emb * gate1, out2 = emb * gate2 for one (tb, F) batch tile."""
    emb = emb_ref[...].astype(jnp.float32)
    out1_ref[...] = (emb * gates_ref[0:1, :]).astype(out1_ref.dtype)
    out2_ref[...] = (emb * gates_ref[1:2, :]).astype(out2_ref.dtype)


def fused_feature_scale(gates, flat_emb, *, tb=None):
    """Apply both gates to flat_emb with one pallas_call (single read of flat_emb)."""
    B, F = flat_emb.shape
    if tb is None:
        # Full batch if small (full-dim exemption from the (8,128) rule), else 512-row tiles
        # (multiple of 8; ~3 arrays * 2 buffers * 512*F*4B stays well under 64 MiB VMEM).
        tb = B if B <= 512 else 512
    grid = (pl.cdiv(B, tb),)
    out_sds = jax.ShapeDtypeStruct((B, F), flat_emb.dtype)

    return pl.pallas_call(
        _scale_kernel,
        out_shape=(out_sds, out_sds),
        grid_spec=pltpu.PrefetchScalarGridSpec(
            num_scalar_prefetch=0,
            grid=grid,
            in_specs=[
                pl.BlockSpec((2, F), lambda i: (0, 0)),     # gates (resident, tiny)
                pl.BlockSpec((tb, F), lambda i: (i, 0)),    # flat_emb tile
            ],
            out_specs=[
                pl.BlockSpec((tb, F), lambda i: (i, 0)),    # feature1 tile
                pl.BlockSpec((tb, F), lambda i: (i, 0)),    # feature2 tile
            ],
        ),
        compiler_params=pltpu.CompilerParams(dimension_semantics=("parallel",)),
    )(gates, flat_emb)


# ---------------------------------------------------------------------------
# Module wrapper
# ---------------------------------------------------------------------------
class FeatureSelectionPallas:
    """FeatureSelection with empty fs1_context / fs2_context (ctx-bias path)."""

    def __init__(self, feature_dim, embedding_dim, fs_hidden_units, key):
        assert len(fs_hidden_units) == 1, "this synthetic setup uses a single hidden layer"
        hidden = fs_hidden_units[0]
        self.embedding_dim = embedding_dim
        self.feature_dim = feature_dim

        k = jax.random.split(key, 4)
        s1 = 1.0 / jnp.sqrt(embedding_dim)
        s2 = 1.0 / jnp.sqrt(hidden)

        # fs{1,2}_ctx_bias = zeros(1, embedding_dim)  (nn.Parameter(torch.zeros(...)))
        self.fs1_ctx_bias = jnp.zeros((1, embedding_dim), jnp.float32)
        self.fs2_ctx_bias = jnp.zeros((1, embedding_dim), jnp.float32)

        # fs1_gate: Linear(E, H) -> ReLU -> Linear(H, F) -> Sigmoid
        self.fs1_w1 = jax.random.uniform(k[0], (embedding_dim, hidden), jnp.float32, -s1, s1)
        self.fs1_b1 = jnp.zeros((1, hidden), jnp.float32)
        self.fs1_w2 = jax.random.uniform(k[1], (hidden, feature_dim), jnp.float32, -s2, s2)
        self.fs1_b2 = jnp.zeros((1, feature_dim), jnp.float32)

        # fs2_gate: same shapes, different init
        self.fs2_w1 = jax.random.uniform(k[2], (embedding_dim, hidden), jnp.float32, -s1, s1)
        self.fs2_b1 = jnp.zeros((1, hidden), jnp.float32)
        self.fs2_w2 = jax.random.uniform(k[3], (hidden, feature_dim), jnp.float32, -s2, s2)
        self.fs2_b2 = jnp.zeros((1, feature_dim), jnp.float32)

    def __call__(self, X, flat_emb, *, tb=None):
        # Empty context -> gate input is the (1, E) ctx bias row (same for every batch row),
        # so the gate MLP is hoisted and computed exactly once per branch.
        gates = compute_gates(
            (self.fs1_ctx_bias, self.fs1_w1, self.fs1_b1, self.fs1_w2, self.fs1_b2),
            (self.fs2_ctx_bias, self.fs2_w1, self.fs2_b1, self.fs2_w2, self.fs2_b2),
        )
        feature1, feature2 = fused_feature_scale(gates, flat_emb, tb=tb)
        return feature1, feature2


def _reference(model, flat_emb):
    """Pure-JAX reference for correctness check (mirrors the PyTorch forward)."""
    B = flat_emb.shape[0]

    def branch(bias, w1, b1, w2, b2):
        x = jnp.broadcast_to(bias, (B, bias.shape[1]))
        h = jnp.maximum(x @ w1 + b1, 0.0)
        g = 2.0 * jax.nn.sigmoid(h @ w2 + b2)
        return flat_emb * g

    f1 = branch(model.fs1_ctx_bias, model.fs1_w1, model.fs1_b1, model.fs1_w2, model.fs1_b2)
    f2 = branch(model.fs2_ctx_bias, model.fs2_w1, model.fs2_b1, model.fs2_w2, model.fs2_b2)
    return f1, f2


if __name__ == "__main__":
    key = jax.random.PRNGKey(0)
    k_model, k_emb, k_x = jax.random.split(key, 3)

    batch = 256
    embedding_dim = 32                          # per-field embedding size
    num_fields = 4
    feature_dim = num_fields * embedding_dim    # 128 = width of flat_emb (lane-dense)
    fs_hidden_units = [32]
    tb = 64                                     # 4 grid steps -> pipelining + megacore sharding

    model = FeatureSelectionPallas(feature_dim, embedding_dim, fs_hidden_units, k_model)

    flat_emb = jax.random.normal(k_emb, (batch, feature_dim), jnp.float32)
    X = jax.random.randint(k_x, (batch, num_fields), 0, 100)   # unused (empty context), API parity

    feature1, feature2 = model(X, flat_emb, tb=tb)
    jax.block_until_ready(feature1)
    jax.block_until_ready(feature2)

    ref1, ref2 = _reference(model, flat_emb)
    assert jnp.allclose(feature1, ref1, atol=1e-5, rtol=1e-5)
    assert jnp.allclose(feature2, ref2, atol=1e-5, rtol=1e-5)

    print("KERNEL_OK")
</pallas_src>

<mosaic_0001>
module attributes {stable_mosaic.version = 11 : i64} {
  func.func @_gate_kernel(%arg0: memref<1x32xf32, #tpu.memory_space<vmem>>, %arg1: memref<32x32xf32, #tpu.memory_space<vmem>>, %arg2: memref<1x32xf32, #tpu.memory_space<vmem>>, %arg3: memref<32x128xf32, #tpu.memory_space<vmem>>, %arg4: memref<1x128xf32, #tpu.memory_space<vmem>>, %arg5: memref<1x32xf32, #tpu.memory_space<vmem>>, %arg6: memref<32x32xf32, #tpu.memory_space<vmem>>, %arg7: memref<1x32xf32, #tpu.memory_space<vmem>>, %arg8: memref<32x128xf32, #tpu.memory_space<vmem>>, %arg9: memref<1x128xf32, #tpu.memory_space<vmem>>, %arg10: memref<2x128xf32, #tpu.memory_space<vmem>>) attributes {dimension_semantics = [], scalar_prefetch = 0 : i64, scratch_operands = 0 : i64, tpu.core_type = #tpu.core_type<tc>} {
    %c0 = arith.constant 0 : index
    %c0_0 = arith.constant 0 : index
    %0 = vector.load %arg0[%c0, %c0_0] : memref<1x32xf32, #tpu.memory_space<vmem>>, vector<1x32xf32>
    %c0_1 = arith.constant 0 : index
    %c0_2 = arith.constant 0 : index
    %1 = vector.load %arg1[%c0_1, %c0_2] : memref<32x32xf32, #tpu.memory_space<vmem>>, vector<32x32xf32>
    %c0_3 = arith.constant 0 : index
    %c0_4 = arith.constant 0 : index
    %2 = vector.load %arg2[%c0_3, %c0_4] : memref<1x32xf32, #tpu.memory_space<vmem>>, vector<1x32xf32>
    %c0_5 = arith.constant 0 : index
    %c0_6 = arith.constant 0 : index
    %3 = vector.load %arg3[%c0_5, %c0_6] : memref<32x128xf32, #tpu.memory_space<vmem>>, vector<32x128xf32>
    %c0_7 = arith.constant 0 : index
    %c0_8 = arith.constant 0 : index
    %4 = vector.load %arg4[%c0_7, %c0_8] : memref<1x128xf32, #tpu.memory_space<vmem>>, vector<1x128xf32>
    %cst = arith.constant dense<0.000000e+00> : vector<1x32xf32>
    %5 = tpu.matmul %0, %1, %cst {dimension_numbers = #tpu.dot_dimension_numbers<[1], [0], [0], [1], [0, 0, 1, 1], [], []>} : vector<1x32xf32>, vector<32x32xf32>, vector<1x32xf32> -> vector<1x32xf32>
    %6 = arith.addf %5, %2 : vector<1x32xf32>
    %cst_9 = arith.constant 0.000000e+00 : f32
    %7 = vector.broadcast %cst_9 : f32 to vector<1x32xf32>
    %8 = arith.maximumf %6, %7 : vector<1x32xf32>
    %cst_10 = arith.constant dense<0.000000e+00> : vector<1x128xf32>
    %9 = tpu.matmul %8, %3, %cst_10 {dimension_numbers = #tpu.dot_dimension_numbers<[1], [0], [0], [1], [0, 0, 1, 1], [], []>} : vector<1x32xf32>, vector<32x128xf32>, vector<1x128xf32> -> vector<1x128xf32>
    %10 = arith.addf %9, %4 : vector<1x128xf32>
    %11 = arith.negf %10 : vector<1x128xf32>
    %12 = math.exp %11 : vector<1x128xf32>
    %cst_11 = arith.constant 1.000000e+00 : f32
    %13 = vector.broadcast %cst_11 : f32 to vector<1x128xf32>
    %14 = arith.addf %13, %12 : vector<1x128xf32>
    %15 = arith.divf %13, %14 : vector<1x128xf32>
    %cst_12 = arith.constant 2.000000e+00 : f32
    %16 = vector.broadcast %cst_12 : f32 to vector<1x128xf32>
    %17 = arith.mulf %16, %15 : vector<1x128xf32>
    %c0_13 = arith.constant 0 : index
    %c0_14 = arith.constant 0 : index
    %18 = vector.load %arg5[%c0_13, %c0_14] : memref<1x32xf32, #tpu.memory_space<vmem>>, vector<1x32xf32>
    %c0_15 = arith.constant 0 : index
    %c0_16 = arith.constant 0 : index
    %19 = vector.load %arg6[%c0_15, %c0_16] : memref<32x32xf32, #tpu.memory_space<vmem>>, vector<32x32xf32>
    %c0_17 = arith.constant 0 : index
    %c0_18 = arith.constant 0 : index
    %20 = vector.load %arg7[%c0_17, %c0_18] : memref<1x32xf32, #tpu.memory_space<vmem>>, vector<1x32xf32>
    %c0_19 = arith.constant 0 : index
    %c0_20 = arith.constant 0 : index
    %21 = vector.load %arg8[%c0_19, %c0_20] : memref<32x128xf32, #tpu.memory_space<vmem>>, vector<32x128xf32>
    %c0_21 = arith.constant 0 : index
    %c0_22 = arith.constant 0 : index
    %22 = vector.load %arg9[%c0_21, %c0_22] : memref<1x128xf32, #tpu.memory_space<vmem>>, vector<1x128xf32>
    %cst_23 = arith.constant dense<0.000000e+00> : vector<1x32xf32>
    %23 = tpu.matmul %18, %19, %cst_23 {dimension_numbers = #tpu.dot_dimension_numbers<[1], [0], [0], [1], [0, 0, 1, 1], [], []>} : vector<1x32xf32>, vector<32x32xf32>, vector<1x32xf32> -> vector<1x32xf32>
    %24 = arith.addf %23, %20 : vector<1x32xf32>
    %cst_24 = arith.constant 0.000000e+00 : f32
    %25 = vector.broadcast %cst_24 : f32 to vector<1x32xf32>
    %26 = arith.maximumf %24, %25 : vector<1x32xf32>
    %cst_25 = arith.constant dense<0.000000e+00> : vector<1x128xf32>
    %27 = tpu.matmul %26, %21, %cst_25 {dimension_numbers = #tpu.dot_dimension_numbers<[1], [0], [0], [1], [0, 0, 1, 1], [], []>} : vector<1x32xf32>, vector<32x128xf32>, vector<1x128xf32> -> vector<1x128xf32>
    %28 = arith.addf %27, %22 : vector<1x128xf32>
    %29 = arith.negf %28 : vector<1x128xf32>
    %30 = math.exp %29 : vector<1x128xf32>
    %cst_26 = arith.constant 1.000000e+00 : f32
    %31 = vector.broadcast %cst_26 : f32 to vector<1x128xf32>
    %32 = arith.addf %31, %30 : vector<1x128xf32>
    %33 = arith.divf %31, %32 : vector<1x128xf32>
    %cst_27 = arith.constant 2.000000e+00 : f32
    %34 = vector.broadcast %cst_27 : f32 to vector<1x128xf32>
    %35 = arith.mulf %34, %33 : vector<1x128xf32>
    %36 = tpu.concatenate %17, %35 in 0 : vector<1x128xf32>, vector<1x128xf32> -> vector<2x128xf32>
    %c0_28 = arith.constant 0 : index
    %c0_29 = arith.constant 0 : index
    %37 = vector.load %arg10[%c0_28, %c0_29] : memref<2x128xf32, #tpu.memory_space<vmem>>, vector<2x128xf32>
    tpu.vector_store %arg10[%c0_28, %c0_29], %36 {strides = array<i32>} : memref<2x128xf32, #tpu.memory_space<vmem>>, vector<2x128xf32>,
    return
  }
}

</mosaic_0001>

<bundles_post_ra>
// kernel: tpu_custom_call.1
= control target key start
LH: loop header
LB: loop body
LE: loop exit
PB: predicated region body
PF: predicated region fallthrough
CT: control target
= control target key end

     0   :  { %15 = vsyncpa [#allocation3], 0  ;;  %s568_s0 = inlined_call_operand.hbm [shape: f32[1,32], index: 0, kind: input, shape index: {}]   ;;  %s569_s1 = inlined_call_operand.hbm [shape: f32[32,32], index: 1, kind: input, shape index: {}]   ;;  %s570_s2 = inlined_call_operand.vmem [shape: f32[1,32], index: 2, kind: input, shape index: {}]   ;;  %s571_s3 = inlined_call_operand.hbm [shape: f32[32,128], index: 3, kind: input, shape index: {}]   ;;  %s572_s4 = inlined_call_operand.vmem [shape: f32[1,128], index: 4, kind: input, shape index: {}]   ;;  %s573_s5 = inlined_call_operand.vmem [shape: f32[1,32], index: 5, kind: input, shape index: {}]   ;;  %s574_s6 = inlined_call_operand.hbm [shape: f32[32,32], index: 6, kind: input, shape index: {}]   ;;  %s575_s7 = inlined_call_operand.vmem [shape: f32[1,32], index: 7, kind: input, shape index: {}]   ;;  %s576_s8 = inlined_call_operand.hbm [shape: f32[32,128], index: 8, kind: input, shape index: {}]   ;;  %s577_s9 = inlined_call_operand.vmem [shape: f32[1,128], index: 9, kind: input, shape index: {}]   ;;  %s578_s10 = inlined_call_operand.hbm [shape: f32[2,128], index: 10, kind: output, shape index: {}]  }
   0x1   :  { %16 = vsyncpa [#allocation6], 0 }
   0x2   :  { %17 = vsyncpa [#allocation9], 0  ;;  %s34_s15 = sshll.u32 %s569_s1, 4  ;;  %s35_s15 = int_to_ptr.hbm [resolvable:$true] %s34_s15 }
   0x3   :  { %18 = vsyncpa [#allocation4], 0  ;;  %s468_s16 = smov [#allocation5]   ;;  %s66_s20 = sshll.u32 %s574_s6, 4  ;;  %s67_s20 = int_to_ptr.hbm [resolvable:$true] %s66_s20 }
   0x4   :  { %s36_s17 = sshll.u32 %s468_s16, 4  ;;  %s469_s21 = smov 128   ;;  %s37_s17 = int_to_ptr.vmem [resolvable:$true] %s36_s17 }
   0x5   :  { %s470_s22 = smov 8   ;;  %s471_s23 = smov [#allocation8]  }
   0x6   :  { %42 = dma.hbm_to_vmem [thread:$0]  %s35_s15, 512, %s37_s17, [#allocation6], %s469_s21, %s469_s21, %s470_s22  }
   0x7   :  { %s68_s24 = sshll.u32 %s471_s23, 4  ;;  %s24_s27 = sshll.u32 %s568_s0, 4  ;;  %s69_s24 = int_to_ptr.vmem [resolvable:$true] %s68_s24  ;;  %s25_s27 = int_to_ptr.hbm [resolvable:$true] %s24_s27 }
   0x8   :  { %74 = dma.hbm_to_vmem [thread:$0]  %s67_s20, 512, %s69_s24, [#allocation9], %s469_s21, %s469_s21, %s470_s22  }
   0x9   :  { %s49_s29 = sshll.u32 %s571_s3, 4  ;;  %s472_s30 = smov [#allocation2]   ;;  %s50_s29 = int_to_ptr.hbm [resolvable:$true] %s49_s29 }
   0xa   :  { %s26_s11 = sshll.u32 %s472_s30, 4  ;;  %s473_s6 = smov [#allocation7]   ;;  %s27_s11 = int_to_ptr.vmem [resolvable:$true] %s26_s11 }
   0xb   :  { %29 = dma.hbm_to_vmem [thread:$0]  %s25_s27, 16, %s27_s11, [#allocation3]  }
   0xc   :  { %s51_s12 = sshll.u32 %s473_s6, 4  ;;  %s81_s15 = sshll.u32 %s576_s8, 4  ;;  %s52_s12 = int_to_ptr.vmem [resolvable:$true] %s51_s12  ;;  %s82_s15 = int_to_ptr.hbm [resolvable:$true] %s81_s15 }
   0xd   :  { %57 = dma.hbm_to_vmem [thread:$0]  %s50_s29, 512, %s52_s12, [#allocation6], %s469_s21, %s469_s21, %s470_s22  }
   0xe   :  { %s474_s0 = smov [#allocation10]  }
   0xf   :  { %s83_s16 = sshll.u32 %s474_s0, 4  ;;  %s84_s16 = int_to_ptr.vmem [resolvable:$true] %s83_s16 }
  0x10   :  { %89 = dma.hbm_to_vmem [thread:$0]  %s82_s15, 512, %s84_s16, [#allocation9], %s469_s21, %s469_s21, %s470_s22  }
  0x11   :  { %460 = dma.done.wait [#allocation3], 16  }
  0x12   :  { %461 = vsyncadd [#allocation3], 4294967280 }
  0x13   :  { %462 = dma.done.wait [#allocation6], 1024  }
  0x14   :  { %463 = vsyncadd [#allocation6], 4294966272 }
  0x15   :  { %464 = dma.done.wait [#allocation9], 1024  }
  0x16   :  { %465 = vsyncadd [#allocation9], 4294966272  ;;  %v195_v0 = vld [vmem:[#allocation8 + $0x18] sm:$0xff]  ;;  %v194_v2 = vld [vmem:[#allocation8 + $0x10] sm:$0xff]  ;;  %vm123_vm0 = vcmask 261120   ;;  %s282_s24 = sshll.u32 %s578_s10, 4  ;;  %s283_s24 = int_to_ptr.hbm [resolvable:$true] %s282_s24 }
  0x17   :  { %v116_v1 = vld [vmem:[#allocation5 + $0x18] sm:$0xff]  ;;  %217 = vmatpush.msra.mxu2 %v195_v0  ;;  %v115_v3 = vld [vmem:[#allocation5 + $0x10] sm:$0xff]  ;;  %v193_v4 = vld [vmem:[#allocation8 + $0x8] sm:$0xff]  ;;  %vm272_vm9 = vcmask 1040384  }
  0x18   :  { %139 = vmatpush.msra.mxu0 %v116_v1  ;;  %v114_v5 = vld [vmem:[#allocation5 + $0x8] sm:$0xff]  ;;  %v121_v6 = vld [vmem:[#allocation7 + $0x18] sm:$0xff]  ;;  %v192_v7 = vld [vmem:[#allocation8] sm:$0xff] }
  0x19   :  { %218 = vmatpush.msra.mxu2 %v194_v2  ;;  %v113_v8 = vld [vmem:[#allocation5] sm:$0xff]  ;;  %163 = vmatpush.msra.mxu1 %v121_v6  ;;  %v191_v9 = vld [vmem:[%s573_s5] sm:$0x1]  ;;  %v120_v11 = vld [vmem:[#allocation7 + $0x10] sm:$0xff] }
  0x1a   :  { %140 = vmatpush.msra.mxu0 %v115_v3  ;;  %v112_v10 = vld [vmem:[#allocation2] sm:$0x1]  ;;  %v119_v12 = vld [vmem:[#allocation7 + $0x8] sm:$0xff]  ;;  %v118_v14 = vld [vmem:[#allocation7] sm:$0xff] }
  0x1b   :  { %219 = vmatpush.msra.mxu2 %v193_v4  ;;  %164 = vmatpush.msra.mxu1 %v120_v11  ;;  %v200_v13 = vld [vmem:[#allocation10 + $0x18] sm:$0xff]  ;;  %v199_v15 = vld [vmem:[#allocation10 + $0x10] sm:$0xff]  ;;  %v198_v16 = vld [vmem:[#allocation10 + $0x8] sm:$0xff] }
  0x1c   :  { %141 = vmatpush.msra.mxu0 %v114_v5  ;;  %241 = vmatpush.msra.mxu3 %v200_v13  ;;  %v197_v17 = vld [vmem:[#allocation10] sm:$0xff]  ;;  %v117_v18 = vld [vmem:[%s570_s2] sm:$0x1] }
  0x1d   :  { %220 = vmatpush.msra.mxu2 %v192_v7  ;;  %165 = vmatpush.msra.mxu1 %v119_v12  ;;  %v196_v22 = vld [vmem:[%s575_s7] sm:$0x1] }
  0x1e   :  { %142 = vmatpush.msra.mxu0 %v113_v8  ;;  %297 = vmatmul.msk.f32.vlgmr.msra.gmra.mxu2 %vm123_vm0, %v191_v9  ;;  %v122_v26 = vld [vmem:[%s572_s4] sm:$0x1]  ;;  %s475_s4 = smov [#allocation11]  }
  0x1f   :  { %294 = vmatmul.msk.f32.vlgmr.msra.gmra.mxu0 %vm123_vm0, %v112_v10  ;;  %166 = vmatpush.msra.mxu1 %v118_v14  ;;  %v201_v30 = vld [vmem:[%s577_s9] sm:$0x1]  ;;  %s280_s7 = sshll.u32 %s475_s4, 4  ;;  %s281_s7 = int_to_ptr.vmem [resolvable:$true] %s280_s7 }
  0x20   :  { %242 = vmatpush.msra.mxu3 %v199_v15 }
  0x22   :  { %243 = vmatpush.msra.mxu3 %v198_v16 }
  0x24   :  { %244 = vmatpush.msra.mxu3 %v197_v17 }
  0x9c   :  { %v144_v19 = vpop.f32.mrf.mxu0 }
  0x9d   :  { %v145_v20 = vadd.f32 %v144_v19, %v117_v18 }
  0x9f   :  { %v147_v21 = vmax.f32 %v145_v20, 0.0 }
  0xa1   :  { %295 = vmatmul.msk.f32.vlgmr.msra.gmra.mxu1 %vm123_vm0, %v147_v21  ;;  %v222_v23 = vpop.f32.mrf.mxu2 }
  0xa2   :  { %v223_v24 = vadd.f32 %v222_v23, %v196_v22 }
  0xa4   :  { %v225_v25 = vmax.f32 %v223_v24, 0.0 }
  0xa6   :  { %298 = vmatmul.msk.f32.vlgmr.msra.gmra.mxu3 %vm123_vm0, %v225_v25 }
 0x11e   :  { %v168_v27 = vpop.f32.mrf.mxu1 }
 0x11f   :  { %v169_v28 = vadd.f32 %v168_v27, %v122_v26 }
 0x121   :  { %v296_v29 = vmul.f32 -1.442695, %v169_v28 }
 0x123   :  { %308 = vpow2.f32 %v296_v29 }
 0x129   :  { %v309_v31 = vpop.eup %308  ;;  %v246_v33 = vpop.f32.mrf.mxu3 }
 0x12a   :  { %v174_v32 = vadd.f32 1.0, %v309_v31  ;;  %v247_v34 = vadd.f32 %v246_v33, %v201_v30 }
 0x12c   :  { %310 = vrcp.f32 %v174_v32  ;;  %v299_v35 = vmul.f32 -1.442695, %v247_v34  ;;  %vm180_vm1 = vweird.f32 %v174_v32  ;;  %v186_v44 = vand.u32 2147483648, %v174_v32 }
 0x12d   :  { %v184_v47 = vand.u32 2147483647, %v174_v32 }
 0x12e   :  { %312 = vpow2.f32 %v299_v35  ;;  %v187_v51 = vor.u32 1.1754944e-38, %v186_v44 }
 0x12f   :  { %vm185_vm5 = vcmp.eq.f32.partialorder %v184_v47, 8.507059e+37 }
 0x132   :  { %v311_v36 = vpop.eup %310 }
 0x133   :  { %v176_v38 = vmul.f32 %v311_v36, %v174_v32  ;;  %vm181_vm2 = vweird.f32 %v311_v36 }
 0x134   :  { %v313_v37 = vpop.eup %312  ;;  %vm182_vm3 = vmor %vm180_vm1, %vm181_vm2 }
 0x135   :  { %v252_v39 = vadd.f32 1.0, %v313_v37  ;;  %v177_v40 = vsub.f32 1.0, %v176_v38 }
 0x137   :  { %314 = vrcp.f32 %v252_v39  ;;  %v178_v41 = vmul.f32 %v311_v36, %v177_v40  ;;  %v264_v48 = vand.u32 2147483648, %v252_v39  ;;  %v262_v50 = vand.u32 2147483647, %v252_v39 }
 0x138   :  { %vm258_vm6 = vweird.f32 %v252_v39 }
 0x139   :  { %v179_v46 = vadd.f32 %v311_v36, %v178_v41  ;;  %v265_v54 = vor.u32 1.1754944e-38, %v264_v48  ;;  %vm263_vm8 = vcmp.eq.f32.partialorder %v262_v50, 8.507059e+37 }
 0x13b   :  { %v183_v52 = vsel %vm182_vm3, %v311_v36, %v179_v46 }
 0x13c   :  { %v188_v56 = vsel %vm185_vm5, %v187_v51, %v183_v52 }
 0x13d   :  { %v315_v42 = vpop.eup %314  ;;  %v190_v59 = vmul.f32 2.0, %v188_v56 }
 0x13e   :  { %v254_v43 = vmul.f32 %v315_v42, %v252_v39  ;;  %vm259_vm4 = vweird.f32 %v315_v42 }
 0x13f   :  { %vm260_vm7 = vmor %vm258_vm6, %vm259_vm4 }
 0x140   :  { %v255_v45 = vsub.f32 1.0, %v254_v43 }
 0x142   :  { %v256_v49 = vmul.f32 %v315_v42, %v255_v45 }
 0x144   :  { %v257_v53 = vadd.f32 %v315_v42, %v256_v49 }
 0x146   :  { %v261_v55 = vsel %vm260_vm7, %v315_v42, %v257_v53 }
 0x147   :  { %v266_v57 = vsel %vm263_vm8, %v265_v54, %v261_v55 }
 0x148   :  { %v268_v58 = vmul.f32 2.0, %v266_v57 }
 0x14a   :  { %v270_v60 = vrot.slane %v268_v58, 7 }
 0x14c   :  { %v273_v61 = vsel %vm272_vm9, %v190_v59, %v270_v60 }
 0x14d   :  { %274 = vst [vmem:[#allocation11] sm:$0x3] %v273_v61 }
 0x14e   :  { %285 = dma.vmem_to_hbm [thread:$0]  %s281_s7, 32, %s283_s24, [#allocation4]  }
 0x14f   :  { %466 = dma.done.wait [#allocation4], 32  }
 0x150   :  { %467 = vsyncadd [#allocation4], 4294967264 }
 0x151   :  { %290 = vsyncpa [#allocation3], 1 }
 0x152   :  { %291 = vsyncpa [#allocation6], 1 }
 0x153   :  { %292 = vsyncpa [#allocation9], 1 }
 0x154   :  { %293 = vsyncpa [#allocation4], 1 }

</bundles_post_ra>
